<compile_context>
chip_gen: v7x
topology: tpu7x:2x2x1
jax: 0.10.0
libtpu: 0.0.40
codegen_flags: <defaults>
</compile_context>

<pallas_src>
import jax
import jax.numpy as jnp
from jax.experimental import pallas as pl
from jax.experimental.pallas import tpu as pltpu


def _round_up(x, m):
    return ((x + m - 1) // m) * m


def _choose_tiles(batch, max_tile):
    """Pick (tile_b, n_tiles, b_pad) with minimal padding and an even tile
    count (>= 2 once the batch is big enough) so v7x's 2 TCs both get work."""
    b8 = _round_up(max(batch, 8), 8)
    if b8 <= 8:
        n_tiles = 1
    elif b8 <= max_tile:
        n_tiles = 2
    else:
        n_tiles = pl.cdiv(b8, max_tile)
        n_tiles += n_tiles % 2          # even tile count for the 2-TC split
    tile_b = _round_up(pl.cdiv(b8, n_tiles), 8)
    return tile_b, n_tiles, tile_b * n_tiles


def critic_kernel(s_ref, a_ref, w1_ref, b1_ref, w2h_ref, w2a_ref, b2_ref,
                  w3_ref, b3_ref, out_ref):
    # lin1 + relu  (f32 MXU matmul, f32 accumulate)
    h1 = jnp.dot(s_ref[...], w1_ref[...], preferred_element_type=jnp.float32)
    h1 = jnp.maximum(h1 + b1_ref[...], 0.0)

    # lin2 over cat((h1, action)) via the weight split — no concat needed.
    z = (jnp.dot(h1, w2h_ref[...], preferred_element_type=jnp.float32)
         + jnp.dot(a_ref[...], w2a_ref[...], preferred_element_type=jnp.float32))
    h2 = jnp.maximum(z + b2_ref[...], 0.0)

    # lin3 (N=1): VPU multiply + XLU row reduce instead of a 1-column MXU pass.
    q = jnp.sum(h2 * w3_ref[...], axis=-1, keepdims=True) + b3_ref[0, 0]
    out_ref[...] = q.astype(out_ref.dtype)


def critic_forward(state, action, params, *, max_tile_b=4096):
    B, S = state.shape
    A = action.shape[1]
    L1 = params["w1"].shape[1]
    L2 = params["w2h"].shape[1]

    tile_b, n_tiles, b_pad = _choose_tiles(B, max_tile_b)

    state = state.astype(jnp.float32)
    action = action.astype(jnp.float32)
    if b_pad != B:
        state = jnp.pad(state, ((0, b_pad - B), (0, 0)))
        action = jnp.pad(action, ((0, b_pad - B), (0, 0)))

    def const(shape):
        # Constant block index -> weight/bias stays resident in VMEM, DMA'd once.
        return pl.BlockSpec(shape, lambda i: (0, 0))

    out = pl.pallas_call(
        critic_kernel,
        out_shape=jax.ShapeDtypeStruct((b_pad, 1), jnp.float32),
        grid=(n_tiles,),
        in_specs=[
            pl.BlockSpec((tile_b, S), lambda i: (i, 0)),        # state (streamed)
            pl.BlockSpec((tile_b, A), lambda i: (i, 0)),        # action (streamed)
            const((S, L1)),                                     # W1
            const((1, L1)),                                     # b1
            const((L1, L2)),                                    # W2 (h1 rows)
            const((A, L2)),                                     # W2 (action rows)
            const((1, L2)),                                     # b2
            const((1, L2)),                                     # w3 row
            pl.BlockSpec(memory_space=pltpu.MemorySpace.SMEM),  # b3 scalar
        ],
        out_specs=pl.BlockSpec((tile_b, 1), lambda i: (i, 0)),
        compiler_params=pltpu.CompilerParams(
            dimension_semantics=("parallel",),
            vmem_limit_bytes=40 * 1024 * 1024),
    )(state, action, params["w1"], params["b1"], params["w2h"],
      params["w2a"], params["b2"], params["w3"], params["b3"])
    return out[:B]


def init_params(key, state_dim, action_dim, layer1, layer2):
    ks = jax.random.split(key, 6)
    s = 0.1
    w1 = s * jax.random.normal(ks[0], (state_dim, layer1), jnp.float32)
    b1 = s * jax.random.normal(ks[1], (1, layer1), jnp.float32)
    w2 = s * jax.random.normal(ks[2], (layer1 + action_dim, layer2), jnp.float32)
    b2 = s * jax.random.normal(ks[3], (1, layer2), jnp.float32)
    w3 = s * jax.random.normal(ks[4], (layer2, 1), jnp.float32)
    b3 = s * jax.random.normal(ks[5], (1, 1), jnp.float32)
    return {
        "w1": w1, "b1": b1,
        "w2h": w2[:layer1, :],            # lin2 weight rows multiplying h1
        "w2a": w2[layer1:, :],            # lin2 weight rows multiplying action
        "b2": b2,
        "w3": jnp.reshape(w3, (1, layer2)),  # row layout for the VPU epilogue
        "b3": b3,
    }


def critic_reference(state, action, params):
    # Plain-JAX mirror of the PyTorch forward (explicit concat, f32 weights).
    h1 = jnp.maximum(state @ params["w1"] + params["b1"], 0.0)
    cat = jnp.concatenate([h1, action], axis=1)
    w2 = jnp.concatenate([params["w2h"], params["w2a"]], axis=0)
    h2 = jnp.maximum(cat @ w2 + params["b2"], 0.0)
    return h2 @ params["w3"].T + params["b3"]


if __name__ == "__main__":
    STATE_DIM, ACTION_DIM = 16, 4
    LAYER1, LAYER2 = 128, 128

    key = jax.random.PRNGKey(0)
    k_params, k_s1, k_a1, k_s2, k_a2 = jax.random.split(key, 5)
    params = init_params(k_params, STATE_DIM, ACTION_DIM, LAYER1, LAYER2)

    # Two cases: tiny single-tile batch, and a multi-tile batch (grid=(2,))
    # exercising the padded path (B=300 -> b_pad=304, tile_b=152).
    for ks, ka, B in [(k_s1, k_a1, 8), (k_s2, k_a2, 300)]:
        state = jax.random.normal(ks, (B, STATE_DIM), jnp.float32)
        action = jax.random.normal(ka, (B, ACTION_DIM), jnp.float32)

        q = jax.block_until_ready(critic_forward(state, action, params))
        q_ref = critic_reference(state, action, params)

        assert q.shape == (B, 1)
        # f32 end-to-end; the only residual difference vs the reference is the
        # MXU's default (bf16-input) matmul precision, same as any XLA f32
        # matmul on TPU -> tolerance tightened 5x vs the previous bf16 kernel.
        err = float(jnp.max(jnp.abs(q - q_ref)))
        assert jnp.allclose(q, q_ref, atol=1e-2, rtol=1e-2), err

    print("KERNEL_OK")
</pallas_src>

<mosaic_0001>
module attributes {stable_mosaic.version = 11 : i64} {
  func.func @critic_kernel(%arg0: i32, %arg1: memref<8x16xf32, #tpu.memory_space<vmem>>, %arg2: memref<8x4xf32, #tpu.memory_space<vmem>>, %arg3: memref<16x128xf32, #tpu.memory_space<vmem>>, %arg4: memref<1x128xf32, #tpu.memory_space<vmem>>, %arg5: memref<128x128xf32, #tpu.memory_space<vmem>>, %arg6: memref<4x128xf32, #tpu.memory_space<vmem>>, %arg7: memref<1x128xf32, #tpu.memory_space<vmem>>, %arg8: memref<1x128xf32, #tpu.memory_space<vmem>>, %arg9: memref<1x1xf32, #tpu.memory_space<smem>>, %arg10: memref<8x1xf32, #tpu.memory_space<vmem>>) attributes {dimension_semantics = [#tpu.dimension_semantics<parallel>], iteration_bounds = array<i64: 1>, scalar_prefetch = 0 : i64, scratch_operands = 0 : i64, tpu.core_type = #tpu.core_type<tc>, window_params = [{transform_indices = @transform_0, window_bounds = array<i64: 8, 16>}, {transform_indices = @transform_1, window_bounds = array<i64: 8, 4>}, {pipeline_mode = #tpu.pipeline_mode<synchronous>, transform_indices = @transform_2, window_bounds = array<i64: 16, 128>}, {pipeline_mode = #tpu.pipeline_mode<synchronous>, transform_indices = @transform_3, window_bounds = array<i64: 1, 128>}, {pipeline_mode = #tpu.pipeline_mode<synchronous>, transform_indices = @transform_4, window_bounds = array<i64: 128, 128>}, {pipeline_mode = #tpu.pipeline_mode<synchronous>, transform_indices = @transform_5, window_bounds = array<i64: 4, 128>}, {pipeline_mode = #tpu.pipeline_mode<synchronous>, transform_indices = @transform_6, window_bounds = array<i64: 1, 128>}, {pipeline_mode = #tpu.pipeline_mode<synchronous>, transform_indices = @transform_7, window_bounds = array<i64: 1, 128>}, {transform_indices = @transform_8, window_bounds = array<i64: 1, 1>}, {transform_indices = @transform_9, window_bounds = array<i64: 8, 1>}]} {
    %c0 = arith.constant 0 : index
    %c0_0 = arith.constant 0 : index
    %0 = vector.load %arg1[%c0, %c0_0] : memref<8x16xf32, #tpu.memory_space<vmem>>, vector<8x16xf32>
    %c0_1 = arith.constant 0 : index
    %c0_2 = arith.constant 0 : index
    %1 = vector.load %arg3[%c0_1, %c0_2] : memref<16x128xf32, #tpu.memory_space<vmem>>, vector<16x128xf32>
    %cst = arith.constant dense<0.000000e+00> : vector<8x128xf32>
    %2 = tpu.matmul %0, %1, %cst {dimension_numbers = #tpu.dot_dimension_numbers<[1], [0], [0], [1], [0, 0, 1, 1], [], []>} : vector<8x16xf32>, vector<16x128xf32>, vector<8x128xf32> -> vector<8x128xf32>
    %c0_3 = arith.constant 0 : index
    %c0_4 = arith.constant 0 : index
    %3 = vector.load %arg4[%c0_3, %c0_4] : memref<1x128xf32, #tpu.memory_space<vmem>>, vector<1x128xf32>
    %4 = vector.broadcast %3 : vector<1x128xf32> to vector<8x128xf32>
    %5 = arith.addf %2, %4 : vector<8x128xf32>
    %cst_5 = arith.constant 0.000000e+00 : f32
    %6 = vector.broadcast %cst_5 : f32 to vector<8x128xf32>
    %7 = arith.maximumf %5, %6 : vector<8x128xf32>
    %c0_6 = arith.constant 0 : index
    %c0_7 = arith.constant 0 : index
    %8 = vector.load %arg5[%c0_6, %c0_7] : memref<128x128xf32, #tpu.memory_space<vmem>>, vector<128x128xf32>
    %cst_8 = arith.constant dense<0.000000e+00> : vector<8x128xf32>
    %9 = tpu.matmul %7, %8, %cst_8 {dimension_numbers = #tpu.dot_dimension_numbers<[1], [0], [0], [1], [0, 0, 1, 1], [], []>} : vector<8x128xf32>, vector<128x128xf32>, vector<8x128xf32> -> vector<8x128xf32>
    %c0_9 = arith.constant 0 : index
    %c0_10 = arith.constant 0 : index
    %10 = vector.load %arg2[%c0_9, %c0_10] : memref<8x4xf32, #tpu.memory_space<vmem>>, vector<8x4xf32>
    %c0_11 = arith.constant 0 : index
    %c0_12 = arith.constant 0 : index
    %11 = vector.load %arg6[%c0_11, %c0_12] : memref<4x128xf32, #tpu.memory_space<vmem>>, vector<4x128xf32>
    %cst_13 = arith.constant dense<0.000000e+00> : vector<8x128xf32>
    %12 = tpu.matmul %10, %11, %cst_13 {dimension_numbers = #tpu.dot_dimension_numbers<[1], [0], [0], [1], [0, 0, 1, 1], [], []>} : vector<8x4xf32>, vector<4x128xf32>, vector<8x128xf32> -> vector<8x128xf32>
    %13 = arith.addf %9, %12 : vector<8x128xf32>
    %c0_14 = arith.constant 0 : index
    %c0_15 = arith.constant 0 : index
    %14 = vector.load %arg7[%c0_14, %c0_15] : memref<1x128xf32, #tpu.memory_space<vmem>>, vector<1x128xf32>
    %15 = vector.broadcast %14 : vector<1x128xf32> to vector<8x128xf32>
    %16 = arith.addf %13, %15 : vector<8x128xf32>
    %cst_16 = arith.constant 0.000000e+00 : f32
    %17 = vector.broadcast %cst_16 : f32 to vector<8x128xf32>
    %18 = arith.maximumf %16, %17 : vector<8x128xf32>
    %c0_17 = arith.constant 0 : index
    %c0_18 = arith.constant 0 : index
    %19 = vector.load %arg8[%c0_17, %c0_18] : memref<1x128xf32, #tpu.memory_space<vmem>>, vector<1x128xf32>
    %20 = vector.broadcast %19 : vector<1x128xf32> to vector<8x128xf32>
    %21 = arith.mulf %18, %20 : vector<8x128xf32>
    %cst_19 = arith.constant dense<0.000000e+00> : vector<8xf32>
    %22 = vector.multi_reduction <add>, %21, %cst_19 [1] : vector<8x128xf32> to vector<8xf32>
    %23 = vector.shape_cast %22 : vector<8xf32> to vector<8x1xf32>
    %c0_20 = arith.constant 0 : index
    %c0_21 = arith.constant 0 : index
    %24 = memref.load %arg9[%c0_20, %c0_21] : memref<1x1xf32, #tpu.memory_space<smem>>
    %25 = vector.broadcast %24 : f32 to vector<8x1xf32>
    %26 = arith.addf %23, %25 : vector<8x1xf32>
    %c0_22 = arith.constant 0 : index
    %c0_23 = arith.constant 0 : index
    %27 = vector.load %arg10[%c0_22, %c0_23] : memref<8x1xf32, #tpu.memory_space<vmem>>, vector<8x1xf32>
    tpu.vector_store %arg10[%c0_22, %c0_23], %26 {strides = array<i32>} : memref<8x1xf32, #tpu.memory_space<vmem>>, vector<8x1xf32>,
    return
  }
  func.func @transform_0(%arg0: i32) -> (i32, i32) {
    %c0_i32 = arith.constant 0 : i32
    %c0_i32_0 = arith.constant 0 : i32
    return %arg0, %c0_i32 : i32, i32
  }
  func.func @transform_1(%arg0: i32) -> (i32, i32) {
    %c0_i32 = arith.constant 0 : i32
    %c0_i32_0 = arith.constant 0 : i32
    return %arg0, %c0_i32 : i32, i32
  }
  func.func @transform_2(%arg0: i32) -> (i32, i32) {
    %c0_i32 = arith.constant 0 : i32
    %c0_i32_0 = arith.constant 0 : i32
    %c0_i32_1 = arith.constant 0 : i32
    return %c0_i32, %c0_i32_0 : i32, i32
  }
  func.func @transform_3(%arg0: i32) -> (i32, i32) {
    %c0_i32 = arith.constant 0 : i32
    %c0_i32_0 = arith.constant 0 : i32
    %c0_i32_1 = arith.constant 0 : i32
    return %c0_i32, %c0_i32_0 : i32, i32
  }
  func.func @transform_4(%arg0: i32) -> (i32, i32) {
    %c0_i32 = arith.constant 0 : i32
    %c0_i32_0 = arith.constant 0 : i32
    %c0_i32_1 = arith.constant 0 : i32
    return %c0_i32, %c0_i32_0 : i32, i32
  }
  func.func @transform_5(%arg0: i32) -> (i32, i32) {
    %c0_i32 = arith.constant 0 : i32
    %c0_i32_0 = arith.constant 0 : i32
    %c0_i32_1 = arith.constant 0 : i32
    return %c0_i32, %c0_i32_0 : i32, i32
  }
  func.func @transform_6(%arg0: i32) -> (i32, i32) {
    %c0_i32 = arith.constant 0 : i32
    %c0_i32_0 = arith.constant 0 : i32
    %c0_i32_1 = arith.constant 0 : i32
    return %c0_i32, %c0_i32_0 : i32, i32
  }
  func.func @transform_7(%arg0: i32) -> (i32, i32) {
    %c0_i32 = arith.constant 0 : i32
    %c0_i32_0 = arith.constant 0 : i32
    %c0_i32_1 = arith.constant 0 : i32
    return %c0_i32, %c0_i32_0 : i32, i32
  }
  func.func @transform_8(%arg0: i32) -> (i32, i32) {
    %c0_i32 = arith.constant 0 : i32
    %c0_i32_0 = arith.constant 0 : i32
    %c0_i32_1 = arith.constant 0 : i32
    return %c0_i32, %c0_i32_0 : i32, i32
  }
  func.func @transform_9(%arg0: i32) -> (i32, i32) {
    %c0_i32 = arith.constant 0 : i32
    %c0_i32_0 = arith.constant 0 : i32
    return %arg0, %c0_i32 : i32, i32
  }
}

</mosaic_0001>

<bundles_post_ra>
// kernel: tpu_custom_call.1
= control target key start
LH: loop header
LB: loop body
LE: loop exit
PB: predicated region body
PF: predicated region fallthrough
CT: control target
= control target key end

     0   :  { %15 = vsyncpa [#allocation4], 0  ;;  %s615_s0 = inlined_call_operand.hbm [shape: f32[8,16], index: 0, kind: input, shape index: {}]   ;;  %s616_s1 = inlined_call_operand.vmem [shape: f32[8,4], index: 1, kind: input, shape index: {}]   ;;  %s617_s2 = inlined_call_operand.vmem [shape: f32[16,128], index: 2, kind: input, shape index: {}]   ;;  %s618_s3 = inlined_call_operand.vmem [shape: f32[1,128], index: 3, kind: input, shape index: {}]   ;;  %s619_s4 = inlined_call_operand.hbm [shape: f32[128,128], index: 4, kind: input, shape index: {}]   ;;  %s620_s5 = inlined_call_operand.vmem [shape: f32[4,128], index: 5, kind: input, shape index: {}]   ;;  %s621_s6 = inlined_call_operand.vmem [shape: f32[1,128], index: 6, kind: input, shape index: {}]   ;;  %s622_s7 = inlined_call_operand.vmem [shape: f32[1,128], index: 7, kind: input, shape index: {}]   ;;  %s623_s8 = inlined_call_operand.<no memory space> [shape: f32[1,1], index: 8, kind: input, shape index: {}]   ;;  %s624_s9 = inlined_call_operand.vmem [shape: f32[8,1], index: 9, kind: output, shape index: {}]  }
   0x1   :  { %16 = vsyncpa [#allocation6], 0  ;;  %s497_s30 = smov [#allocation3]   ;;  %s498_s11 = smov [#allocation5]  }
   0x2   :  { %s23_s10 = sshll.u32 %s497_s30, 4  ;;  %s38_s12 = sshll.u32 %s498_s11, 4  ;;  %s24_s10 = int_to_ptr.vmem [resolvable:$true] %s23_s10  ;;  %s554_s12 = int_to_ptr.vmem [resolvable:$true] %s38_s12 }
   0x3   :  { %s449_s15 = scalar_lea.hbm %s615_s0, 128 }
   0x4   :  { %p450_p0 = scmp.ne.s32.totalorder %s615_s0, %s449_s15  ;;  %p453_p1 = scmp.lt.u32.totalorder %s449_s15, %s615_s0 }
   0x6   :  { %p455_p2 = pnand %p453_p1, %p450_p0 }
   0x8   :  { %458 = shalt.err (!%p455_p2)
}
   0x9   :  { %s459_s20 = scalar_lea.vmem %s24_s10, 128  ;;  %p464_p4 = scmp.lt.s32.totalorder %s24_s10, %s24_s10 }
   0xa   :  { %p460_p3 = scmp.ne.s32.totalorder %s24_s10, %s459_s20  ;;  %p465_p5 = scmp.lt.s32.totalorder %s459_s20, %s459_s20 }
   0xc   :  { %p466_p6 = por %p465_p5, %p464_p4 }
   0xe   :  { %p467_p7 = pnand %p466_p6, %p460_p3 }
  0x10   :  { %470 = shalt.err (!%p467_p7)
}
  0x11   :  { %26 = dma.hbm_to_vmem [thread:$0]  %s615_s0, 128, %s24_s10, [#allocation4]  }
  0x12   :  { %s471_s25 = scalar_lea.hbm %s619_s4, 2048 }
  0x13   :  { %p472_p8 = scmp.ne.s32.totalorder %s619_s4, %s471_s25  ;;  %p475_p9 = scmp.lt.u32.totalorder %s471_s25, %s619_s4 }
  0x15   :  { %p477_p10 = pnand %p475_p9, %p472_p8 }
  0x17   :  { %480 = shalt.err (!%p477_p10)
}
  0x18   :  { %s481_s30 = scalar_lea.vmem %s554_s12, 2048  ;;  %p486_p12 = scmp.lt.s32.totalorder %s554_s12, %s554_s12 }
  0x19   :  { %p482_p11 = scmp.ne.s32.totalorder %s554_s12, %s481_s30  ;;  %p487_p13 = scmp.lt.s32.totalorder %s481_s30, %s481_s30 }
  0x1b   :  { %p488_p0 = por %p487_p13, %p486_p12 }
  0x1d   :  { %p489_p1 = pnand %p488_p0, %p482_p11 }
  0x1f   :  { %492 = shalt.err (!%p489_p1)
}
  0x20   :  { %s499_s0 = smov 128   ;;  %s500_s10 = smov 8  }
  0x21   :  { %44 = dma.hbm_to_vmem [thread:$0]  %s619_s4, 2048, %s554_s12, [#allocation6], %s499_s0, %s499_s0, %s500_s10  }
  0x22   :  { %493 = dma.done.wait [#allocation4], 128  }
  0x23   :  { %494 = vsyncadd [#allocation4], 4294967168 }
  0x24   :  { %495 = dma.done.wait [#allocation6], 2048  }
  0x25   :  { %496 = vsyncadd [#allocation6], 4294965248  ;;  %v501_v0 = vmov 0.0|0.0   ;;  %vm502_vm0 = vmmov 0   ;;  %v503_v1 = vmov 0.0   ;;  %v60_v2 = vld [vmem:[%s617_s2] sm:$0xff]  ;;  %v330_v47 = vstv %s623_s8 }
  0x26   :  { %415 = vmatprep.subr.bf16.mxu0 %v501_v0  ;;  %372 = vmatprep.mubr.msk.f32.mxu0 %vm502_vm0, %v503_v1  ;;  %v61_v3 = vld [vmem:[%s617_s2 + $0x8] sm:$0xff]  ;;  %v145_v6 = vld [vmem:[#allocation5 + $0x8] sm:$0xff]  ;;  %v146_v7 = vld [vmem:[#allocation5 + $0x10] sm:$0xff]  ;;  %vm69_vm1 = vcmask 130048   ;;  %vm166_vm2 = vcmask 1043456   ;;  %vm162_vm3 = vcmask 31744  }
  0x27   :  { %418 = vmatprep.subr.bf16.mxu1 %v501_v0  ;;  %412 = vmatprep.mubr.msk.f32.mxu1 %vm502_vm0, %v503_v1  ;;  %v416_v4 = vpack.c.bf16 %v61_v3, %v60_v2  ;;  %v144_v5 = vld [vmem:[#allocation5] sm:$0xff]  ;;  %v147_v9 = vld [vmem:[#allocation5 + $0x18] sm:$0xff]  ;;  %v149_v13 = vld [vmem:[#allocation5 + $0x28] sm:$0xff]  ;;  %vm332_vm4 = vcmask 7168  }
  0x28   :  { %v419_v8 = vpack.c.bf16 %v145_v6, %v144_v5  ;;  %v59_v10 = vld [vmem:[#allocation3] sm:$0xff]  ;;  %v422_v11 = vpack.c.bf16 %v147_v9, %v146_v7  ;;  %v148_v12 = vld [vmem:[#allocation5 + $0x20] sm:$0xff]  ;;  %v150_v15 = vld [vmem:[#allocation5 + $0x30] sm:$0xff] }
  0x29   :  { %417 = vmatpush3.bf16.msra.mxu0 %v416_v4  ;;  %v425_v14 = vpack.c.bf16 %v149_v13, %v148_v12  ;;  %v151_v16 = vld [vmem:[#allocation5 + $0x38] sm:$0xff]  ;;  %v152_v18 = vld [vmem:[#allocation5 + $0x40] sm:$0xff]  ;;  %v153_v19 = vld [vmem:[#allocation5 + $0x48] sm:$0xff] }
  0x2a   :  { %420 = vmatpush3.bf16.msra.mxu1 %v419_v8  ;;  %375 = vmatprep.subr.mxu0 %v503_v1  ;;  %v428_v17 = vpack.c.bf16 %v151_v16, %v150_v15  ;;  %v431_v20 = vpack.c.bf16 %v153_v19, %v152_v18  ;;  %v154_v21 = vld [vmem:[#allocation5 + $0x50] sm:$0xff]  ;;  %v155_v22 = vld [vmem:[#allocation5 + $0x58] sm:$0xff]  ;;  %v156_v24 = vld [vmem:[#allocation5 + $0x60] sm:$0xff] }
  0x2b   :  { %421 = vmatprep.subr.bf16.mxu1 %v501_v0  ;;  %v434_v23 = vpack.c.bf16 %v155_v22, %v154_v21  ;;  %v157_v25 = vld [vmem:[#allocation5 + $0x68] sm:$0xff]  ;;  %v158_v27 = vld [vmem:[#allocation5 + $0x70] sm:$0xff]  ;;  %v159_v28 = vld [vmem:[#allocation5 + $0x78] sm:$0xff] }
  0x2c   :  { %373 = vmatmul.mubr.msk.f32.vlgmr.msra.gmra.mrb[0].mxu0 %vm69_vm1, %v59_v10  ;;  %v437_v26 = vpack.c.bf16 %v157_v25, %v156_v24  ;;  %v440_v29 = vpack.c.bf16 %v159_v28, %v158_v27  ;;  %v161_v30 = vld [vmem:[%s620_s5] sm:$0xf] }
  0x2d   :  { %377 = vmatprep.mubr.msk.f32.mxu0 %vm502_vm0, %v503_v1  ;;  %376 = vmatpush3.msk.msra.mxu0 %vm166_vm2, %v161_v30  ;;  %v160_v31 = vld [vmem:[%s616_s1] sm:$0xff] }
  0x2e   :  { %423 = vmatpush3.bf16.msra.mxu1 %v422_v11  ;;  %v340_v32 = vld [vmem:[%s618_s3] ss:$0 sm:$0xff] }
  0x2f   :  { %424 = vmatprep.subr.bf16.mxu1 %v501_v0  ;;  %v344_v40 = vld [vmem:[%s621_s6] ss:$0 sm:$0xff] }
  0x30   :  { %378 = vmatmul.mubr.msk.f32.vlgmr.msra.gmra.mrb[2].mxu0 %vm162_vm3, %v160_v31  ;;  %v345_v44 = vld [vmem:[%s622_s7] ss:$0 sm:$0xff] }
  0x32   :  { %426 = vmatpush3.bf16.msra.mxu1 %v425_v14 }
  0x33   :  { %427 = vmatprep.subr.bf16.mxu1 %v501_v0 }
  0x36   :  { %429 = vmatpush3.bf16.msra.mxu1 %v428_v17 }
  0x37   :  { %430 = vmatprep.subr.bf16.mxu1 %v501_v0 }
  0x3a   :  { %432 = vmatpush3.bf16.msra.mxu1 %v431_v20 }
  0x3b   :  { %433 = vmatprep.subr.bf16.mxu1 %v501_v0 }
  0x3e   :  { %435 = vmatpush3.bf16.msra.mxu1 %v434_v23 }
  0x3f   :  { %436 = vmatprep.subr.bf16.mxu1 %v501_v0 }
  0x42   :  { %438 = vmatpush3.bf16.msra.mxu1 %v437_v26 }
  0x43   :  { %439 = vmatprep.subr.bf16.mxu1 %v501_v0 }
  0x46   :  { %441 = vmatpush3.bf16.msra.mxu1 %v440_v29 }
  0xff   :  { %v139_v33 = vpop.f32.mrb[0].mxu0 }
 0x100   :  { %v140_v34 = vadd.f32 %v340_v32, %v139_v33  ;;  %v374_v35 = vpop.f32.mrb[1].mxu0 }
 0x102   :  { %v143_v36 = vmax.f32 %v140_v34, 0.0 }
 0x103   :  { %v236_v37 = vpop.f32.mrb[2].mxu0 }
 0x104   :  { %413 = vmatmul.mubr.f32.vlgmr.msra.gmra.mrb[0].mxu1 %v143_v36  ;;  %v379_v38 = vpop.f32.mrb[3].mxu0 }
 0x1d7   :  { %v306_v39 = vpop.f32.mrb[0].mxu1 }
 0x1d8   :  { %v307_v41 = vadd.f32 %v306_v39, %v236_v37  ;;  %v414_v42 = vpop.f32.mrb[1].mxu1 }
 0x1da   :  { %v317_v43 = vadd.f32 %v344_v40, %v307_v41 }
 0x1dc   :  { %v318_v45 = vmax.f32 %v317_v43, 0.0 }
 0x1de   :  { %v326_v46 = vmul.f32 %v345_v44, %v318_v45 }
 0x1e0   :  { %327 = vadd.xlane.f32.xlu0 %v326_v46 }
 0x26d   :  { %v328_v48 = vpop.xlane.xlu0 %327 }
 0x26e   :  { %v331_v49 = vadd.f32 %v330_v47, %v328_v48 }
 0x270   :  { %333 = vst.msk [vmem:[%s624_s9] sm:$0xff] %vm332_vm4, %v331_v49 }
 0x271   :  { %338 = vsyncpa [#allocation4], 1 }
 0x272   :  { %339 = vsyncpa [#allocation6], 1 }

</bundles_post_ra>
